<compile_context>
chip_gen: v5e
topology: v5e:2x2
jax: 0.10.0
libtpu: 0.0.40
codegen_flags: <defaults>
</compile_context>

<pallas_src>
import jax
import jax.numpy as jnp
from jax import lax
from jax.experimental import pallas as pl
from jax.experimental.pallas import tpu as pltpu


def _round_up(x, m):
    return ((x + m - 1) // m) * m


def _pad_to(a, target_shape):
    pads = [(0, t - s) for s, t in zip(a.shape, target_shape)]
    if all(p == (0, 0) for p in pads):
        return a
    return jnp.pad(a, pads)


def _make_rnn_kernel(total_t, t_chunk):
    # Whether every chunk is full (static trip count -> allows unrolling).
    full_chunks = (total_t % t_chunk == 0)

    def rnn_kernel(x_ref, wih_ref, whh_ref, b_ref, wfc_ref, bfc_ref,
                   out_ref, h_scratch, xw_scratch):
        c = pl.program_id(0)
        n_chunks = pl.num_programs(0)
        tc, bp, ep = x_ref.shape
        hp = whh_ref.shape[0]

        @pl.when(c == 0)
        def _():
            h_scratch[...] = jnp.zeros_like(h_scratch)

        # --- Non-recurrent input projection for the whole chunk -------------
        # One MXU-shaped (Tc*Bp, Ep) x (Ep, Hp) matmul with the pre-summed bias
        # folded in; the broadcast happens once per chunk, not per timestep.
        x_flat = x_ref[...].reshape(tc * bp, ep)
        xw = jnp.dot(x_flat, wih_ref[...],
                     preferred_element_type=jnp.float32) + b_ref[...]
        xw_scratch[...] = xw.reshape(tc, bp, hp)

        # --- Serial recurrence: only h @ W_hh + xw[t] + tanh per step -------
        whh = whh_ref[...]                      # hoisted out of the loop
        h0 = h_scratch[...]

        def step(t, h):
            return jnp.tanh(
                xw_scratch[t]
                + jnp.dot(h, whh, preferred_element_type=jnp.float32))

        if full_chunks:
            h = lax.fori_loop(0, tc, step, h0, unroll=tc <= 16)
        else:
            # Last chunk may be partial; padded (zero) timesteps must be skipped
            # because the bias is folded into xw.
            steps = jnp.minimum(tc, total_t - c * tc)
            h = lax.fori_loop(0, steps, step, h0)

        h_scratch[...] = h

        # --- Final FC on the last hidden state, fused in the last chunk -----
        @pl.when(c == n_chunks - 1)
        def _():
            out_ref[...] = (
                jnp.dot(h, wfc_ref[...], preferred_element_type=jnp.float32)
                + bfc_ref[...]).astype(out_ref.dtype)

    return rnn_kernel


def rnn_forward(text, emb_table, w_ih, w_hh, b_ih, b_hh, w_fc, b_fc,
                *, t_chunk=128):
    # text: [T, B] int32 token ids
    T, B = text.shape
    E = emb_table.shape[1]
    H = w_hh.shape[0]
    O = w_fc.shape[1]

    # Embedding gather (plain-JAX glue): [T, B, E].
    # TODO(synk): could move the gather in-kernel with scalar-prefetched token ids
    # + a pl.Element row-gather BlockSpec to avoid one extra HBM pass over [T,B,E].
    embedded = emb_table[text].astype(jnp.float32)

    # Pad to vreg-aligned shapes: batch -> x8 (sublane), feature dims -> x128 (lane).
    Bp = _round_up(B, 8)
    Ep = _round_up(E, 128)
    Hp = _round_up(H, 128)
    Op = _round_up(O, 128)

    Tc = min(t_chunk, T)
    n_chunks = pl.cdiv(T, Tc)
    Tp = n_chunks * Tc

    x_p = _pad_to(embedded, (Tp, Bp, Ep))
    wih_p = _pad_to(w_ih.astype(jnp.float32), (Ep, Hp))
    whh_p = _pad_to(w_hh.astype(jnp.float32), (Hp, Hp))
    b_p = _pad_to((b_ih + b_hh).reshape(1, H).astype(jnp.float32), (1, Hp))
    wfc_p = _pad_to(w_fc.astype(jnp.float32), (Hp, Op))
    bfc_p = _pad_to(b_fc.reshape(1, O).astype(jnp.float32), (1, Op))

    kernel = _make_rnn_kernel(T, Tc)

    out_p = pl.pallas_call(
        kernel,
        out_shape=jax.ShapeDtypeStruct((Bp, Op), jnp.float32),
        grid_spec=pltpu.PrefetchScalarGridSpec(
            num_scalar_prefetch=0,
            grid=(n_chunks,),
            in_specs=[
                pl.BlockSpec((Tc, Bp, Ep), lambda c: (c, 0, 0)),  # chunk of timesteps
                pl.BlockSpec((Ep, Hp), lambda c: (0, 0)),
                pl.BlockSpec((Hp, Hp), lambda c: (0, 0)),
                pl.BlockSpec((1, Hp), lambda c: (0, 0)),          # b_ih + b_hh (pre-summed)
                pl.BlockSpec((Hp, Op), lambda c: (0, 0)),
                pl.BlockSpec((1, Op), lambda c: (0, 0)),
            ],
            out_specs=pl.BlockSpec((Bp, Op), lambda c: (0, 0)),   # resident, written at last chunk
            scratch_shapes=[
                pltpu.VMEM((Bp, Hp), jnp.float32),      # hidden-state carry across chunks
                pltpu.VMEM((Tc, Bp, Hp), jnp.float32),  # per-chunk x @ W_ih + b
            ],
        ),
        compiler_params=pltpu.CompilerParams(
            # Serial recurrence: this axis must stay "arbitrary" (never parallel).
            dimension_semantics=("arbitrary",),
        ),
    )(x_p, wih_p, whh_p, b_p, wfc_p, bfc_p)

    return out_p[:B, :O]


def reference_forward(text, emb_table, w_ih, w_hh, b_ih, b_hh, w_fc, b_fc):
    embedded = emb_table[text]                                  # [T, B, E]

    def step(h, x_t):
        h_new = jnp.tanh(x_t @ w_ih + h @ w_hh + b_ih + b_hh)
        return h_new, h_new

    B = text.shape[1]
    H = w_hh.shape[0]
    h0 = jnp.zeros((B, H), jnp.float32)
    h_last, _ = jax.lax.scan(step, h0, embedded)
    return h_last @ w_fc + b_fc


if __name__ == "__main__":
    # Module dims: input_dim (vocab), embedding_dim, hidden_dim, output_dim
    input_dim, embedding_dim, hidden_dim, output_dim = 50, 32, 32, 8
    seq_len, batch = 8, 2

    key = jax.random.PRNGKey(0)
    k0, k1, k2, k3, k4, k5, k6, k7 = jax.random.split(key, 8)

    # Deterministic parameter init (shapes mirror the PyTorch module, transposed
    # to right-multiply form).
    emb_table = jax.random.normal(k0, (input_dim, embedding_dim), jnp.float32) * 0.1
    w_ih = jax.random.normal(k1, (embedding_dim, hidden_dim), jnp.float32) * 0.1
    w_hh = jax.random.normal(k2, (hidden_dim, hidden_dim), jnp.float32) * 0.1
    b_ih = jax.random.normal(k3, (1, hidden_dim), jnp.float32) * 0.1
    b_hh = jax.random.normal(k4, (1, hidden_dim), jnp.float32) * 0.1
    w_fc = jax.random.normal(k5, (hidden_dim, output_dim), jnp.float32) * 0.1
    b_fc = jax.random.normal(k6, (1, output_dim), jnp.float32) * 0.1

    text = jax.random.randint(k7, (seq_len, batch), 0, input_dim, jnp.int32)

    out = rnn_forward(text, emb_table, w_ih, w_hh, b_ih, b_hh, w_fc, b_fc)
    out = jax.block_until_ready(out)

    ref = reference_forward(text, emb_table, w_ih, w_hh, b_ih, b_hh, w_fc, b_fc)
    assert out.shape == (batch, output_dim)
    assert jnp.allclose(out, ref, atol=1e-5, rtol=1e-5)

    print("KERNEL_OK")
</pallas_src>

<mosaic_0001>
module attributes {stable_mosaic.version = 11 : i64} {
  func.func @rnn_kernel(%arg0: i32, %arg1: memref<8x8x128xf32, #tpu.memory_space<vmem>>, %arg2: memref<128x128xf32, #tpu.memory_space<vmem>>, %arg3: memref<128x128xf32, #tpu.memory_space<vmem>>, %arg4: memref<1x128xf32, #tpu.memory_space<vmem>>, %arg5: memref<128x128xf32, #tpu.memory_space<vmem>>, %arg6: memref<1x128xf32, #tpu.memory_space<vmem>>, %arg7: memref<8x128xf32, #tpu.memory_space<vmem>>, %arg8: memref<8x128xf32, #tpu.memory_space<vmem>>, %arg9: memref<8x8x128xf32, #tpu.memory_space<vmem>>) attributes {dimension_semantics = [#tpu.dimension_semantics<arbitrary>], iteration_bounds = array<i64: 1>, scalar_prefetch = 0 : i64, scratch_operands = 2 : i64, tpu.core_type = #tpu.core_type<tc>, window_params = [{transform_indices = @transform_0, window_bounds = array<i64: 8, 8, 128>}, {pipeline_mode = #tpu.pipeline_mode<synchronous>, transform_indices = @transform_1, window_bounds = array<i64: 128, 128>}, {pipeline_mode = #tpu.pipeline_mode<synchronous>, transform_indices = @transform_2, window_bounds = array<i64: 128, 128>}, {pipeline_mode = #tpu.pipeline_mode<synchronous>, transform_indices = @transform_3, window_bounds = array<i64: 1, 128>}, {pipeline_mode = #tpu.pipeline_mode<synchronous>, transform_indices = @transform_4, window_bounds = array<i64: 128, 128>}, {pipeline_mode = #tpu.pipeline_mode<synchronous>, transform_indices = @transform_5, window_bounds = array<i64: 1, 128>}, {pipeline_mode = #tpu.pipeline_mode<synchronous>, transform_indices = @transform_6, window_bounds = array<i64: 8, 128>}]} {
    %c0_i32 = arith.constant 0 : i32
    %0 = arith.cmpi eq, %arg0, %c0_i32 : i32
    %1 = arith.extui %0 : i1 to i32
    %c0_i32_0 = arith.constant 0 : i32
    %2 = arith.cmpi ne, %1, %c0_i32_0 : i32
    scf.if %2 {
      %cst_43 = arith.constant 0.000000e+00 : f32
      %66 = vector.broadcast %cst_43 : f32 to vector<8x128xf32>
      %c0_44 = arith.constant 0 : index
      %c0_45 = arith.constant 0 : index
      %67 = vector.load %arg8[%c0_44, %c0_45] : memref<8x128xf32, #tpu.memory_space<vmem>>, vector<8x128xf32>
      tpu.vector_store %arg8[%c0_44, %c0_45], %66 {strides = array<i32>} : memref<8x128xf32, #tpu.memory_space<vmem>>, vector<8x128xf32>,
    } else {
    }
    %c0 = arith.constant 0 : index
    %c0_1 = arith.constant 0 : index
    %c0_2 = arith.constant 0 : index
    %3 = vector.load %arg1[%c0, %c0_1, %c0_2] : memref<8x8x128xf32, #tpu.memory_space<vmem>>, vector<8x8x128xf32>
    %4 = vector.shape_cast %3 : vector<8x8x128xf32> to vector<64x128xf32>
    %c0_3 = arith.constant 0 : index
    %c0_4 = arith.constant 0 : index
    %5 = vector.load %arg2[%c0_3, %c0_4] : memref<128x128xf32, #tpu.memory_space<vmem>>, vector<128x128xf32>
    %cst = arith.constant dense<0.000000e+00> : vector<64x128xf32>
    %6 = tpu.matmul %4, %5, %cst {dimension_numbers = #tpu.dot_dimension_numbers<[1], [0], [0], [1], [0, 0, 1, 1], [], []>} : vector<64x128xf32>, vector<128x128xf32>, vector<64x128xf32> -> vector<64x128xf32>
    %c0_5 = arith.constant 0 : index
    %c0_6 = arith.constant 0 : index
    %7 = vector.load %arg4[%c0_5, %c0_6] : memref<1x128xf32, #tpu.memory_space<vmem>>, vector<1x128xf32>
    %8 = vector.broadcast %7 : vector<1x128xf32> to vector<64x128xf32>
    %9 = arith.addf %6, %8 : vector<64x128xf32>
    %10 = vector.shape_cast %9 : vector<64x128xf32> to vector<8x8x128xf32>
    %c0_7 = arith.constant 0 : index
    %c0_8 = arith.constant 0 : index
    %c0_9 = arith.constant 0 : index
    %11 = vector.load %arg9[%c0_7, %c0_8, %c0_9] : memref<8x8x128xf32, #tpu.memory_space<vmem>>, vector<8x8x128xf32>
    tpu.vector_store %arg9[%c0_7, %c0_8, %c0_9], %10 {strides = array<i32>} : memref<8x8x128xf32, #tpu.memory_space<vmem>>, vector<8x8x128xf32>,
    %c0_10 = arith.constant 0 : index
    %c0_11 = arith.constant 0 : index
    %12 = vector.load %arg3[%c0_10, %c0_11] : memref<128x128xf32, #tpu.memory_space<vmem>>, vector<128x128xf32>
    %c0_12 = arith.constant 0 : index
    %c0_13 = arith.constant 0 : index
    %13 = vector.load %arg8[%c0_12, %c0_13] : memref<8x128xf32, #tpu.memory_space<vmem>>, vector<8x128xf32>
    %c0_i32_14 = arith.constant 0 : i32
    %14 = arith.index_cast %c0_i32_14 : i32 to index
    %c0_15 = arith.constant 0 : index
    %c0_16 = arith.constant 0 : index
    %15 = vector.load %arg9[%14, %c0_15, %c0_16] : memref<8x8x128xf32, #tpu.memory_space<vmem>>, vector<1x8x128xf32>
    %16 = vector.shape_cast %15 : vector<1x8x128xf32> to vector<8x128xf32>
    %cst_17 = arith.constant dense<0.000000e+00> : vector<8x128xf32>
    %17 = tpu.matmul %13, %12, %cst_17 {dimension_numbers = #tpu.dot_dimension_numbers<[1], [0], [0], [1], [0, 0, 1, 1], [], []>} : vector<8x128xf32>, vector<128x128xf32>, vector<8x128xf32> -> vector<8x128xf32>
    %18 = arith.addf %16, %17 : vector<8x128xf32>
    %19 = math.tanh %18 : vector<8x128xf32>
    %c1_i32 = arith.constant 1 : i32
    %20 = arith.index_cast %c1_i32 : i32 to index
    %c0_18 = arith.constant 0 : index
    %c0_19 = arith.constant 0 : index
    %21 = vector.load %arg9[%20, %c0_18, %c0_19] : memref<8x8x128xf32, #tpu.memory_space<vmem>>, vector<1x8x128xf32>
    %22 = vector.shape_cast %21 : vector<1x8x128xf32> to vector<8x128xf32>
    %cst_20 = arith.constant dense<0.000000e+00> : vector<8x128xf32>
    %23 = tpu.matmul %19, %12, %cst_20 {dimension_numbers = #tpu.dot_dimension_numbers<[1], [0], [0], [1], [0, 0, 1, 1], [], []>} : vector<8x128xf32>, vector<128x128xf32>, vector<8x128xf32> -> vector<8x128xf32>
    %24 = arith.addf %22, %23 : vector<8x128xf32>
    %25 = math.tanh %24 : vector<8x128xf32>
    %c2_i32 = arith.constant 2 : i32
    %26 = arith.index_cast %c2_i32 : i32 to index
    %c0_21 = arith.constant 0 : index
    %c0_22 = arith.constant 0 : index
    %27 = vector.load %arg9[%26, %c0_21, %c0_22] : memref<8x8x128xf32, #tpu.memory_space<vmem>>, vector<1x8x128xf32>
    %28 = vector.shape_cast %27 : vector<1x8x128xf32> to vector<8x128xf32>
    %cst_23 = arith.constant dense<0.000000e+00> : vector<8x128xf32>
    %29 = tpu.matmul %25, %12, %cst_23 {dimension_numbers = #tpu.dot_dimension_numbers<[1], [0], [0], [1], [0, 0, 1, 1], [], []>} : vector<8x128xf32>, vector<128x128xf32>, vector<8x128xf32> -> vector<8x128xf32>
    %30 = arith.addf %28, %29 : vector<8x128xf32>
    %31 = math.tanh %30 : vector<8x128xf32>
    %c3_i32 = arith.constant 3 : i32
    %32 = arith.index_cast %c3_i32 : i32 to index
    %c0_24 = arith.constant 0 : index
    %c0_25 = arith.constant 0 : index
    %33 = vector.load %arg9[%32, %c0_24, %c0_25] : memref<8x8x128xf32, #tpu.memory_space<vmem>>, vector<1x8x128xf32>
    %34 = vector.shape_cast %33 : vector<1x8x128xf32> to vector<8x128xf32>
    %cst_26 = arith.constant dense<0.000000e+00> : vector<8x128xf32>
    %35 = tpu.matmul %31, %12, %cst_26 {dimension_numbers = #tpu.dot_dimension_numbers<[1], [0], [0], [1], [0, 0, 1, 1], [], []>} : vector<8x128xf32>, vector<128x128xf32>, vector<8x128xf32> -> vector<8x128xf32>
    %36 = arith.addf %34, %35 : vector<8x128xf32>
    %37 = math.tanh %36 : vector<8x128xf32>
    %c4_i32 = arith.constant 4 : i32
    %38 = arith.index_cast %c4_i32 : i32 to index
    %c0_27 = arith.constant 0 : index
    %c0_28 = arith.constant 0 : index
    %39 = vector.load %arg9[%38, %c0_27, %c0_28] : memref<8x8x128xf32, #tpu.memory_space<vmem>>, vector<1x8x128xf32>
    %40 = vector.shape_cast %39 : vector<1x8x128xf32> to vector<8x128xf32>
    %cst_29 = arith.constant dense<0.000000e+00> : vector<8x128xf32>
    %41 = tpu.matmul %37, %12, %cst_29 {dimension_numbers = #tpu.dot_dimension_numbers<[1], [0], [0], [1], [0, 0, 1, 1], [], []>} : vector<8x128xf32>, vector<128x128xf32>, vector<8x128xf32> -> vector<8x128xf32>
    %42 = arith.addf %40, %41 : vector<8x128xf32>
    %43 = math.tanh %42 : vector<8x128xf32>
    %c5_i32 = arith.constant 5 : i32
    %44 = arith.index_cast %c5_i32 : i32 to index
    %c0_30 = arith.constant 0 : index
    %c0_31 = arith.constant 0 : index
    %45 = vector.load %arg9[%44, %c0_30, %c0_31] : memref<8x8x128xf32, #tpu.memory_space<vmem>>, vector<1x8x128xf32>
    %46 = vector.shape_cast %45 : vector<1x8x128xf32> to vector<8x128xf32>
    %cst_32 = arith.constant dense<0.000000e+00> : vector<8x128xf32>
    %47 = tpu.matmul %43, %12, %cst_32 {dimension_numbers = #tpu.dot_dimension_numbers<[1], [0], [0], [1], [0, 0, 1, 1], [], []>} : vector<8x128xf32>, vector<128x128xf32>, vector<8x128xf32> -> vector<8x128xf32>
    %48 = arith.addf %46, %47 : vector<8x128xf32>
    %49 = math.tanh %48 : vector<8x128xf32>
    %c6_i32 = arith.constant 6 : i32
    %50 = arith.index_cast %c6_i32 : i32 to index
    %c0_33 = arith.constant 0 : index
    %c0_34 = arith.constant 0 : index
    %51 = vector.load %arg9[%50, %c0_33, %c0_34] : memref<8x8x128xf32, #tpu.memory_space<vmem>>, vector<1x8x128xf32>
    %52 = vector.shape_cast %51 : vector<1x8x128xf32> to vector<8x128xf32>
    %cst_35 = arith.constant dense<0.000000e+00> : vector<8x128xf32>
    %53 = tpu.matmul %49, %12, %cst_35 {dimension_numbers = #tpu.dot_dimension_numbers<[1], [0], [0], [1], [0, 0, 1, 1], [], []>} : vector<8x128xf32>, vector<128x128xf32>, vector<8x128xf32> -> vector<8x128xf32>
    %54 = arith.addf %52, %53 : vector<8x128xf32>
    %55 = math.tanh %54 : vector<8x128xf32>
    %c7_i32 = arith.constant 7 : i32
    %56 = arith.index_cast %c7_i32 : i32 to index
    %c0_36 = arith.constant 0 : index
    %c0_37 = arith.constant 0 : index
    %57 = vector.load %arg9[%56, %c0_36, %c0_37] : memref<8x8x128xf32, #tpu.memory_space<vmem>>, vector<1x8x128xf32>
    %58 = vector.shape_cast %57 : vector<1x8x128xf32> to vector<8x128xf32>
    %cst_38 = arith.constant dense<0.000000e+00> : vector<8x128xf32>
    %59 = tpu.matmul %55, %12, %cst_38 {dimension_numbers = #tpu.dot_dimension_numbers<[1], [0], [0], [1], [0, 0, 1, 1], [], []>} : vector<8x128xf32>, vector<128x128xf32>, vector<8x128xf32> -> vector<8x128xf32>
    %60 = arith.addf %58, %59 : vector<8x128xf32>
    %61 = math.tanh %60 : vector<8x128xf32>
    %c8_i32 = arith.constant 8 : i32
    %c0_39 = arith.constant 0 : index
    %c0_40 = arith.constant 0 : index
    %62 = vector.load %arg8[%c0_39, %c0_40] : memref<8x128xf32, #tpu.memory_space<vmem>>, vector<8x128xf32>
    tpu.vector_store %arg8[%c0_39, %c0_40], %61 {strides = array<i32>} : memref<8x128xf32, #tpu.memory_space<vmem>>, vector<8x128xf32>,
    %c0_i32_41 = arith.constant 0 : i32
    %63 = arith.cmpi eq, %arg0, %c0_i32_41 : i32
    %64 = arith.extui %63 : i1 to i32
    %c0_i32_42 = arith.constant 0 : i32
    %65 = arith.cmpi ne, %64, %c0_i32_42 : i32
    scf.if %65 {
      %c0_43 = arith.constant 0 : index
      %c0_44 = arith.constant 0 : index
      %66 = vector.load %arg5[%c0_43, %c0_44] : memref<128x128xf32, #tpu.memory_space<vmem>>, vector<128x128xf32>
      %cst_45 = arith.constant dense<0.000000e+00> : vector<8x128xf32>
      %67 = tpu.matmul %61, %66, %cst_45 {dimension_numbers = #tpu.dot_dimension_numbers<[1], [0], [0], [1], [0, 0, 1, 1], [], []>} : vector<8x128xf32>, vector<128x128xf32>, vector<8x128xf32> -> vector<8x128xf32>
      %c0_46 = arith.constant 0 : index
      %c0_47 = arith.constant 0 : index
      %68 = vector.load %arg6[%c0_46, %c0_47] : memref<1x128xf32, #tpu.memory_space<vmem>>, vector<1x128xf32>
      %69 = vector.broadcast %68 : vector<1x128xf32> to vector<8x128xf32>
      %70 = arith.addf %67, %69 : vector<8x128xf32>
      %c0_48 = arith.constant 0 : index
      %c0_49 = arith.constant 0 : index
      %71 = vector.load %arg7[%c0_48, %c0_49] : memref<8x128xf32, #tpu.memory_space<vmem>>, vector<8x128xf32>
      tpu.vector_store %arg7[%c0_48, %c0_49], %70 {strides = array<i32>} : memref<8x128xf32, #tpu.memory_space<vmem>>, vector<8x128xf32>,
    } else {
    }
    return
  }
  func.func @transform_0(%arg0: i32) -> (i32, i32, i32) {
    %c0_i32 = arith.constant 0 : i32
    %c0_i32_0 = arith.constant 0 : i32
    %c0_i32_1 = arith.constant 0 : i32
    return %arg0, %c0_i32, %c0_i32_0 : i32, i32, i32
  }
  func.func @transform_1(%arg0: i32) -> (i32, i32) {
    %c0_i32 = arith.constant 0 : i32
    %c0_i32_0 = arith.constant 0 : i32
    %c0_i32_1 = arith.constant 0 : i32
    return %c0_i32, %c0_i32_0 : i32, i32
  }
  func.func @transform_2(%arg0: i32) -> (i32, i32) {
    %c0_i32 = arith.constant 0 : i32
    %c0_i32_0 = arith.constant 0 : i32
    %c0_i32_1 = arith.constant 0 : i32
    return %c0_i32, %c0_i32_0 : i32, i32
  }
  func.func @transform_3(%arg0: i32) -> (i32, i32) {
    %c0_i32 = arith.constant 0 : i32
    %c0_i32_0 = arith.constant 0 : i32
    %c0_i32_1 = arith.constant 0 : i32
    return %c0_i32, %c0_i32_0 : i32, i32
  }
  func.func @transform_4(%arg0: i32) -> (i32, i32) {
    %c0_i32 = arith.constant 0 : i32
    %c0_i32_0 = arith.constant 0 : i32
    %c0_i32_1 = arith.constant 0 : i32
    return %c0_i32, %c0_i32_0 : i32, i32
  }
  func.func @transform_5(%arg0: i32) -> (i32, i32) {
    %c0_i32 = arith.constant 0 : i32
    %c0_i32_0 = arith.constant 0 : i32
    %c0_i32_1 = arith.constant 0 : i32
    return %c0_i32, %c0_i32_0 : i32, i32
  }
  func.func @transform_6(%arg0: i32) -> (i32, i32) {
    %c0_i32 = arith.constant 0 : i32
    %c0_i32_0 = arith.constant 0 : i32
    %c0_i32_1 = arith.constant 0 : i32
    return %c0_i32, %c0_i32_0 : i32, i32
  }
}

</mosaic_0001>

<bundles_post_ra>
// kernel: tpu_custom_call.1
= control target key start
LH: loop header
LB: loop body
LE: loop exit
PB: predicated region body
PF: predicated region fallthrough
CT: control target
= control target key end

     0   :  { %11 = vsyncpa [#allocation5], 0  ;;  %s829_s0 = inlined_call_operand.hbm [shape: f32[8,8,128], index: 0, kind: input, shape index: {}]   ;;  %s830_s1 = inlined_call_operand.hbm [shape: f32[128,128], index: 1, kind: input, shape index: {}]   ;;  %s831_s2 = inlined_call_operand.hbm [shape: f32[128,128], index: 2, kind: input, shape index: {}]   ;;  %s832_s3 = inlined_call_operand.vmem [shape: f32[1,128], index: 3, kind: input, shape index: {}]   ;;  %s833_s4 = inlined_call_operand.hbm [shape: f32[128,128], index: 4, kind: input, shape index: {}]   ;;  %s834_s5 = inlined_call_operand.vmem [shape: f32[1,128], index: 5, kind: input, shape index: {}]   ;;  %s835_s6 = inlined_call_operand.hbm [shape: f32[8,128], index: 6, kind: output, shape index: {}]  }
   0x1   :  { %12 = vsyncpa [#allocation8], 0 }
   0x2   :  { %13 = vsyncpa [#allocation11], 0 }
   0x3   :  { %14 = vsyncpa [#allocation6], 0  ;;  %s32_s23 = sshll.u32 %s830_s1, 4  ;;  %s595_s24 = smov [#allocation7]   ;;  %s33_s23 = int_to_ptr.hbm [resolvable:$true] %s32_s23 }
   0x4   :  { %s34_s25 = sshll.u32 %s595_s24, 4  ;;  %s19_s28 = sshll.u32 %s829_s0, 4  ;;  %s35_s25 = int_to_ptr.vmem [resolvable:$true] %s34_s25  ;;  %s20_s28 = int_to_ptr.hbm [resolvable:$true] %s19_s28 }
   0x5   :  { %s596_s29 = smov 128   ;;  %s597_s30 = smov 8  }
   0x6   :  { %40 = dma.hbm_to_vmem [thread:$0]  %s33_s23, 2048, %s35_s25, [#allocation8], %s596_s29, %s596_s29, %s597_s30  }
   0x7   :  { %s598_s7 = smov [#allocation4]   ;;  %s45_s11 = sshll.u32 %s831_s2, 4  ;;  %s46_s11 = int_to_ptr.hbm [resolvable:$true] %s45_s11 }
   0x8   :  { %s21_s8 = sshll.u32 %s598_s7, 4  ;;  %s60_s13 = sshll.u32 %s833_s4, 4  ;;  %s22_s8 = int_to_ptr.vmem [resolvable:$true] %s21_s8  ;;  %s61_s13 = int_to_ptr.hbm [resolvable:$true] %s60_s13 }
   0x9   :  { %27 = dma.hbm_to_vmem [thread:$0]  %s20_s28, 1024, %s22_s8, [#allocation5], %s596_s29, %s596_s29, %s597_s30  }
   0xa   :  { %s599_s14 = smov [#allocation9]   ;;  %s600_s0 = smov [#allocation10]  }
   0xb   :  { %s47_s15 = sshll.u32 %s599_s14, 4  ;;  %s62_s16 = sshll.u32 %s600_s0, 4  ;;  %s48_s15 = int_to_ptr.vmem [resolvable:$true] %s47_s15  ;;  %s63_s16 = int_to_ptr.vmem [resolvable:$true] %s62_s16 }
   0xc   :  { %53 = dma.hbm_to_vmem [thread:$0]  %s46_s11, 2048, %s48_s15, [#allocation8], %s596_s29, %s596_s29, %s597_s30  }
   0xd   :  { %68 = dma.hbm_to_vmem [thread:$0]  %s61_s13, 2048, %s63_s16, [#allocation11], %s596_s29, %s596_s29, %s597_s30  }
   0xe   :  { %587 = dma.done.wait [#allocation5], 1024  }
   0xf   :  { %588 = vsyncadd [#allocation5], 4294966272 }
  0x10   :  { %589 = dma.done.wait [#allocation8], 4096  }
  0x11   :  { %590 = vsyncadd [#allocation8], 4294963200 }
  0x12   :  { %591 = dma.done.wait [#allocation11], 2048  }
  0x13   :  { %592 = vsyncadd [#allocation11], 4294965248  ;;  %v115_v0 = vld [vmem:[#allocation7 + $0x78] sm:$0xff]  ;;  %v114_v1 = vld [vmem:[#allocation7 + $0x70] sm:$0xff]  ;;  %v601_v33 = vmov 0.0   ;;  %s602_s18 = smov [#allocation12]  }
  0x14   :  { %v650_v2 = vld [vmem:[#allocation9 + $0x78] sm:$0xff]  ;;  %120 = vmatpush.msra.mxu0 %v115_v0  ;;  %v653_v3 = vld [vmem:[#allocation9 + $0x70] sm:$0xff]  ;;  %v113_v4 = vld [vmem:[#allocation7 + $0x68] sm:$0xff]  ;;  %s427_s19 = sshll.u32 %s602_s18, 4  ;;  %s429_s22 = sshll.u32 %s835_s6, 4  ;;  %s428_s19 = int_to_ptr.vmem [resolvable:$true] %s427_s19  ;;  %s430_s22 = int_to_ptr.hbm [resolvable:$true] %s429_s22 }
  0x15   :  { %187 = vmatpush.msra.mxu1 %v650_v2  ;;  %v655_v5 = vld [vmem:[#allocation9 + $0x68] sm:$0xff]  ;;  %211 = vmatpush.msra.mxu2 %v650_v2  ;;  %v112_v6 = vld [vmem:[#allocation7 + $0x60] sm:$0xff]  ;;  %v111_v8 = vld [vmem:[#allocation7 + $0x58] sm:$0xff] }
  0x16   :  { %235 = vmatpush.msra.mxu3 %v650_v2  ;;  %121 = vmatpush.msra.mxu0 %v114_v1  ;;  %v660_v7 = vld [vmem:[#allocation9 + $0x60] sm:$0xff]  ;;  %v665_v9 = vld [vmem:[#allocation9 + $0x58] sm:$0xff]  ;;  %v110_v10 = vld [vmem:[#allocation7 + $0x50] sm:$0xff] }
  0x17   :  { %188 = vmatpush.msra.mxu1 %v653_v3  ;;  %212 = vmatpush.msra.mxu2 %v653_v3  ;;  %v670_v11 = vld [vmem:[#allocation9 + $0x50] sm:$0xff]  ;;  %v109_v12 = vld [vmem:[#allocation7 + $0x48] sm:$0xff]  ;;  %v108_v14 = vld [vmem:[#allocation7 + $0x40] sm:$0xff] }
  0x18   :  { %236 = vmatpush.msra.mxu3 %v653_v3  ;;  %122 = vmatpush.msra.mxu0 %v113_v4  ;;  %v675_v13 = vld [vmem:[#allocation9 + $0x48] sm:$0xff]  ;;  %v680_v15 = vld [vmem:[#allocation9 + $0x40] sm:$0xff]  ;;  %v107_v16 = vld [vmem:[#allocation7 + $0x38] sm:$0xff] }
  0x19   :  { %189 = vmatpush.msra.mxu1 %v655_v5  ;;  %213 = vmatpush.msra.mxu2 %v655_v5  ;;  %v685_v17 = vld [vmem:[#allocation9 + $0x38] sm:$0xff]  ;;  %v106_v18 = vld [vmem:[#allocation7 + $0x30] sm:$0xff]  ;;  %v105_v20 = vld [vmem:[#allocation7 + $0x28] sm:$0xff] }
  0x1a   :  { %237 = vmatpush.msra.mxu3 %v655_v5  ;;  %123 = vmatpush.msra.mxu0 %v112_v6  ;;  %v690_v19 = vld [vmem:[#allocation9 + $0x30] sm:$0xff]  ;;  %v695_v21 = vld [vmem:[#allocation9 + $0x28] sm:$0xff]  ;;  %v104_v22 = vld [vmem:[#allocation7 + $0x20] sm:$0xff] }
  0x1b   :  { %190 = vmatpush.msra.mxu1 %v660_v7  ;;  %214 = vmatpush.msra.mxu2 %v660_v7  ;;  %v700_v23 = vld [vmem:[#allocation9 + $0x20] sm:$0xff]  ;;  %v103_v24 = vld [vmem:[#allocation7 + $0x18] sm:$0xff]  ;;  %v102_v26 = vld [vmem:[#allocation7 + $0x10] sm:$0xff] }
  0x1c   :  { %238 = vmatpush.msra.mxu3 %v660_v7  ;;  %124 = vmatpush.msra.mxu0 %v111_v8  ;;  %v705_v25 = vld [vmem:[#allocation9 + $0x18] sm:$0xff]  ;;  %v710_v27 = vld [vmem:[#allocation9 + $0x10] sm:$0xff]  ;;  %v101_v28 = vld [vmem:[#allocation7 + $0x8] sm:$0xff] }
  0x1d   :  { %191 = vmatpush.msra.mxu1 %v665_v9  ;;  %215 = vmatpush.msra.mxu2 %v665_v9  ;;  %v715_v29 = vld [vmem:[#allocation9 + $0x8] sm:$0xff]  ;;  %v100_v30 = vld [vmem:[#allocation7] sm:$0xff]  ;;  %v94_v41 = vld [vmem:[#allocation4 + $0x10] sm:$0xff] }
  0x1e   :  { %239 = vmatpush.msra.mxu3 %v665_v9  ;;  %125 = vmatpush.msra.mxu0 %v110_v10  ;;  %v720_v31 = vld [vmem:[#allocation9] sm:$0xff]  ;;  %v93_v34 = vld [vmem:[#allocation4 + $0x8] sm:$0xff]  ;;  %v95_v47 = vld [vmem:[#allocation4 + $0x18] sm:$0xff] }
  0x1f   :  { %192 = vmatpush.msra.mxu1 %v670_v11  ;;  %216 = vmatpush.msra.mxu2 %v670_v11  ;;  %v92_v32 = vld [vmem:[#allocation4] sm:$0xff]  ;;  %v97_v59 = vld [vmem:[#allocation4 + $0x28] sm:$0xff]  ;;  %v98_v60 = vld [vmem:[#allocation4 + $0x30] sm:$0xff] }
  0x20   :  { %240 = vmatpush.msra.mxu3 %v670_v11  ;;  %126 = vmatpush.msra.mxu0 %v109_v12  ;;  %v813_v35 = vld [vmem:[%s832_s3] ss:$0 sm:$0xff]  ;;  %v396_v8 = vld [vmem:[#allocation10 + $0x78] sm:$0xff] }
  0x21   :  { %193 = vmatpush.msra.mxu1 %v675_v13  ;;  %217 = vmatpush.msra.mxu2 %v675_v13  ;;  %v96_v53 = vld [vmem:[#allocation4 + $0x20] sm:$0xff] }
  0x22   :  { %241 = vmatpush.msra.mxu3 %v675_v13  ;;  %127 = vmatpush.msra.mxu0 %v108_v14  ;;  %v393_v12 = vld [vmem:[#allocation10 + $0x60] sm:$0xff]  ;;  %v391_v14 = vld [vmem:[#allocation10 + $0x50] sm:$0xff] }
  0x23   :  { %194 = vmatpush.msra.mxu1 %v680_v15  ;;  %218 = vmatpush.msra.mxu2 %v680_v15 }
  0x24   :  { %242 = vmatpush.msra.mxu3 %v680_v15  ;;  %128 = vmatpush.msra.mxu0 %v107_v16 }
  0x25   :  { %195 = vmatpush.msra.mxu1 %v685_v17  ;;  %219 = vmatpush.msra.mxu2 %v685_v17 }
  0x26   :  { %243 = vmatpush.msra.mxu3 %v685_v17  ;;  %129 = vmatpush.msra.mxu0 %v106_v18  ;;  %v388_v18 = vld [vmem:[#allocation10 + $0x38] sm:$0xff] }
  0x27   :  { %196 = vmatpush.msra.mxu1 %v690_v19  ;;  %220 = vmatpush.msra.mxu2 %v690_v19 }
  0x28   :  { %244 = vmatpush.msra.mxu3 %v690_v19  ;;  %130 = vmatpush.msra.mxu0 %v105_v20  ;;  %v386_v20 = vld [vmem:[#allocation10 + $0x28] sm:$0xff] }
  0x29   :  { %197 = vmatpush.msra.mxu1 %v695_v21  ;;  %221 = vmatpush.msra.mxu2 %v695_v21 }
  0x2a   :  { %245 = vmatpush.msra.mxu3 %v695_v21  ;;  %131 = vmatpush.msra.mxu0 %v104_v22 }
  0x2b   :  { %198 = vmatpush.msra.mxu1 %v700_v23  ;;  %222 = vmatpush.msra.mxu2 %v700_v23 }
  0x2c   :  { %246 = vmatpush.msra.mxu3 %v700_v23  ;;  %132 = vmatpush.msra.mxu0 %v103_v24 }
  0x2d   :  { %199 = vmatpush.msra.mxu1 %v705_v25  ;;  %223 = vmatpush.msra.mxu2 %v705_v25 }
  0x2e   :  { %247 = vmatpush.msra.mxu3 %v705_v25  ;;  %133 = vmatpush.msra.mxu0 %v102_v26  ;;  %v384_v26 = vld [vmem:[#allocation10 + $0x18] sm:$0xff] }
  0x2f   :  { %200 = vmatpush.msra.mxu1 %v710_v27  ;;  %224 = vmatpush.msra.mxu2 %v710_v27 }
  0x30   :  { %248 = vmatpush.msra.mxu3 %v710_v27  ;;  %134 = vmatpush.msra.mxu0 %v101_v28  ;;  %v382_v28 = vld [vmem:[#allocation10 + $0x8] sm:$0xff] }
  0x31   :  { %201 = vmatpush.msra.mxu1 %v715_v29  ;;  %225 = vmatpush.msra.mxu2 %v715_v29 }
  0x32   :  { %249 = vmatpush.msra.mxu3 %v715_v29  ;;  %135 = vmatpush.msra.mxu0 %v100_v30 }
  0x33   :  { %202 = vmatpush.msra.mxu1 %v720_v31  ;;  %136 = vmatmul.f32.vlgmr.msra.gmra.mxu0 %v92_v32 }
  0x34   :  { %203 = vmatmul.f32.vlgmr.msra.gmra.mxu1 %v601_v33  ;;  %226 = vmatpush.msra.mxu2 %v720_v31 }
  0x35   :  { %250 = vmatpush.msra.mxu3 %v720_v31  ;;  %259 = vmatpush.msrb.mxu1 %v650_v2 }
  0x36   :  { %283 = vmatpush.msrb.mxu2 %v650_v2  ;;  %331 = vmatpush.msrb.mxu0 %v650_v2 }
  0x37   :  { %307 = vmatpush.msrb.mxu3 %v650_v2  ;;  %260 = vmatpush.msrb.mxu1 %v653_v3 }
  0x38   :  { %284 = vmatpush.msrb.mxu2 %v653_v3  ;;  %332 = vmatpush.msrb.mxu0 %v653_v3 }
  0x39   :  { %308 = vmatpush.msrb.mxu3 %v653_v3  ;;  %261 = vmatpush.msrb.mxu1 %v655_v5 }
  0x3a   :  { %285 = vmatpush.msrb.mxu2 %v655_v5  ;;  %333 = vmatpush.msrb.mxu0 %v655_v5 }
  0x3b   :  { %309 = vmatpush.msrb.mxu3 %v655_v5  ;;  %262 = vmatpush.msrb.mxu1 %v660_v7 }
  0x3c   :  { %286 = vmatpush.msrb.mxu2 %v660_v7  ;;  %334 = vmatpush.msrb.mxu0 %v660_v7 }
  0x3d   :  { %310 = vmatpush.msrb.mxu3 %v660_v7  ;;  %263 = vmatpush.msrb.mxu1 %v665_v9 }
  0x3e   :  { %287 = vmatpush.msrb.mxu2 %v665_v9  ;;  %335 = vmatpush.msrb.mxu0 %v665_v9 }
  0x3f   :  { %311 = vmatpush.msrb.mxu3 %v665_v9  ;;  %264 = vmatpush.msrb.mxu1 %v670_v11 }
  0x40   :  { %288 = vmatpush.msrb.mxu2 %v670_v11  ;;  %336 = vmatpush.msrb.mxu0 %v670_v11 }
  0x41   :  { %312 = vmatpush.msrb.mxu3 %v670_v11  ;;  %265 = vmatpush.msrb.mxu1 %v675_v13 }
  0x42   :  { %289 = vmatpush.msrb.mxu2 %v675_v13  ;;  %337 = vmatpush.msrb.mxu0 %v675_v13 }
  0x43   :  { %313 = vmatpush.msrb.mxu3 %v675_v13  ;;  %266 = vmatpush.msrb.mxu1 %v680_v15 }
  0x44   :  { %290 = vmatpush.msrb.mxu2 %v680_v15  ;;  %338 = vmatpush.msrb.mxu0 %v680_v15 }
  0x45   :  { %314 = vmatpush.msrb.mxu3 %v680_v15  ;;  %267 = vmatpush.msrb.mxu1 %v685_v17 }
  0x46   :  { %291 = vmatpush.msrb.mxu2 %v685_v17  ;;  %339 = vmatpush.msrb.mxu0 %v685_v17 }
  0x47   :  { %315 = vmatpush.msrb.mxu3 %v685_v17  ;;  %268 = vmatpush.msrb.mxu1 %v690_v19 }
  0x48   :  { %292 = vmatpush.msrb.mxu2 %v690_v19  ;;  %340 = vmatpush.msrb.mxu0 %v690_v19 }
  0x49   :  { %316 = vmatpush.msrb.mxu3 %v690_v19  ;;  %269 = vmatpush.msrb.mxu1 %v695_v21 }
  0x4a   :  { %293 = vmatpush.msrb.mxu2 %v695_v21  ;;  %341 = vmatpush.msrb.mxu0 %v695_v21 }
  0x4b   :  { %317 = vmatpush.msrb.mxu3 %v695_v21  ;;  %270 = vmatpush.msrb.mxu1 %v700_v23 }
  0x4c   :  { %294 = vmatpush.msrb.mxu2 %v700_v23  ;;  %342 = vmatpush.msrb.mxu0 %v700_v23 }
  0x4d   :  { %318 = vmatpush.msrb.mxu3 %v700_v23  ;;  %271 = vmatpush.msrb.mxu1 %v705_v25 }
  0x4e   :  { %295 = vmatpush.msrb.mxu2 %v705_v25  ;;  %343 = vmatpush.msrb.mxu0 %v705_v25 }
  0x4f   :  { %319 = vmatpush.msrb.mxu3 %v705_v25  ;;  %272 = vmatpush.msrb.mxu1 %v710_v27 }
  0x50   :  { %296 = vmatpush.msrb.mxu2 %v710_v27  ;;  %344 = vmatpush.msrb.mxu0 %v710_v27 }
  0x51   :  { %320 = vmatpush.msrb.mxu3 %v710_v27  ;;  %273 = vmatpush.msrb.mxu1 %v715_v29 }
  0x52   :  { %297 = vmatpush.msrb.mxu2 %v715_v29  ;;  %345 = vmatpush.msrb.mxu0 %v715_v29 }
  0x53   :  { %321 = vmatpush.msrb.mxu3 %v715_v29  ;;  %274 = vmatpush.msrb.mxu1 %v720_v31 }
  0x54   :  { %298 = vmatpush.msrb.mxu2 %v720_v31  ;;  %346 = vmatpush.msrb.mxu0 %v720_v31 }
  0x55   :  { %322 = vmatpush.msrb.mxu3 %v720_v31  ;;  %355 = vmatpush.msra.mxu1 %v650_v2  ;;  %v99_v2 = vld [vmem:[#allocation4 + $0x38] sm:$0xff] }
  0x56   :  { %139 = vmatmul.f32.gmra.mxu0 %v93_v34  ;;  %v450_v34 = vld [vmem:[%s834_s5] ss:$0 sm:$0xff] }
  0x57   :  { %356 = vmatpush.msra.mxu1 %v653_v3 }
  0x59   :  { %357 = vmatpush.msra.mxu1 %v655_v5 }
  0x5b   :  { %358 = vmatpush.msra.mxu1 %v660_v7 }
  0x5d   :  { %359 = vmatpush.msra.mxu1 %v665_v9  ;;  %v395_v9 = vld [vmem:[#allocation10 + $0x70] sm:$0xff] }
  0x5e   :  { %142 = vmatmul.f32.gmra.mxu0 %v94_v41 }
  0x5f   :  { %360 = vmatpush.msra.mxu1 %v670_v11  ;;  %v394_v11 = vld [vmem:[#allocation10 + $0x68] sm:$0xff] }
  0x61   :  { %361 = vmatpush.msra.mxu1 %v675_v13  ;;  %v392_v13 = vld [vmem:[#allocation10 + $0x58] sm:$0xff] }
  0x63   :  { %362 = vmatpush.msra.mxu1 %v680_v15  ;;  %v390_v15 = vld [vmem:[#allocation10 + $0x48] sm:$0xff] }
  0x65   :  { %363 = vmatpush.msra.mxu1 %v685_v17  ;;  %v389_v17 = vld [vmem:[#allocation10 + $0x40] sm:$0xff] }
  0x66   :  { %145 = vmatmul.f32.gmra.mxu0 %v95_v47 }
  0x67   :  { %364 = vmatpush.msra.mxu1 %v690_v19  ;;  %v387_v19 = vld [vmem:[#allocation10 + $0x30] sm:$0xff] }
  0x69   :  { %365 = vmatpush.msra.mxu1 %v695_v21 }
  0x6b   :  { %366 = vmatpush.msra.mxu1 %v700_v23 }
  0x6d   :  { %367 = vmatpush.msra.mxu1 %v705_v25  ;;  %v385_v25 = vld [vmem:[#allocation10 + $0x20] sm:$0xff] }
  0x6e   :  { %148 = vmatmul.f32.gmra.mxu0 %v96_v53 }
  0x6f   :  { %368 = vmatpush.msra.mxu1 %v710_v27  ;;  %v383_v27 = vld [vmem:[#allocation10 + $0x10] sm:$0xff] }
  0x71   :  { %369 = vmatpush.msra.mxu1 %v715_v29  ;;  %v381_v29 = vld [vmem:[#allocation10] sm:$0xff] }
  0x73   :  { %370 = vmatpush.msra.mxu1 %v720_v31 }
  0x76   :  { %151 = vmatmul.f32.gmra.mxu0 %v97_v59 }
  0x7e   :  { %154 = vmatmul.f32.gmra.mxu0 %v98_v60 }
  0x86   :  { %157 = vmatmul.f32.gmra.mxu0 %v99_v2 }
  0xb0   :  { %v137_v36 = vpop.f32.mrf.mxu0 }
  0xb1   :  { %v204_v37 = vpop.f32.mrf.mxu1  ;;  %v138_v38 = vadd.f32 %v813_v35, %v137_v36 }
  0xb3   :  { %v207_v39 = vadd.f32 %v204_v37, %v138_v38 }
  0xb5   :  { %451 = vtanh.f32 %v207_v39 }
  0xbb   :  { %v452_v40 = vpop.eup %451 }
  0xbc   :  { %227 = vmatmul.f32.vlgmr.msra.gmra.mxu2 %v452_v40 }
  0xbd   :  { %401 = vmatpush.msra.mxu2 %v396_v8 }
  0xbf   :  { %402 = vmatpush.msra.mxu2 %v395_v9 }
  0xc1   :  { %403 = vmatpush.msra.mxu2 %v394_v11 }
  0xc3   :  { %404 = vmatpush.msra.mxu2 %v393_v12 }
  0xc5   :  { %405 = vmatpush.msra.mxu2 %v392_v13 }
  0xc7   :  { %406 = vmatpush.msra.mxu2 %v391_v14 }
  0xc9   :  { %407 = vmatpush.msra.mxu2 %v390_v15 }
  0xcb   :  { %408 = vmatpush.msra.mxu2 %v389_v17 }
  0xcd   :  { %409 = vmatpush.msra.mxu2 %v388_v18 }
  0xcf   :  { %410 = vmatpush.msra.mxu2 %v387_v19 }
  0xd1   :  { %411 = vmatpush.msra.mxu2 %v386_v20 }
  0xd3   :  { %v140_v42 = vpop.f32.mrf.mxu0  ;;  %412 = vmatpush.msra.mxu2 %v385_v25 }
  0xd4   :  { %v141_v43 = vadd.f32 %v813_v35, %v140_v42 }
  0xd5   :  { %413 = vmatpush.msra.mxu2 %v384_v26 }
  0xd7   :  { %414 = vmatpush.msra.mxu2 %v383_v27 }
  0xd9   :  { %415 = vmatpush.msra.mxu2 %v382_v28 }
  0xdb   :  { %v143_v48 = vpop.f32.mrf.mxu0  ;;  %416 = vmatpush.msra.mxu2 %v381_v29 }
  0xdc   :  { %v144_v49 = vadd.f32 %v813_v35, %v143_v48 }
  0xe3   :  { %v146_v54 = vpop.f32.mrf.mxu0 }
  0xe4   :  { %v147_v55 = vadd.f32 %v813_v35, %v146_v54 }
  0xeb   :  { %v149_v61 = vpop.f32.mrf.mxu0 }
  0xec   :  { %v150_v62 = vadd.f32 %v813_v35, %v149_v61 }
  0xf3   :  { %v152_v3 = vpop.f32.mrf.mxu0 }
  0xf4   :  { %v153_v4 = vadd.f32 %v813_v35, %v152_v3 }
  0xfb   :  { %v155_v10 = vpop.f32.mrf.mxu0 }
  0xfc   :  { %v156_v21 = vadd.f32 %v813_v35, %v155_v10 }
 0x103   :  { %v158_v16 = vpop.f32.mrf.mxu0 }
 0x104   :  { %v159_v30 = vadd.f32 %v813_v35, %v158_v16 }
 0x13f   :  { %v228_v44 = vpop.f32.mrf.mxu2 }
 0x140   :  { %v231_v45 = vadd.f32 %v228_v44, %v141_v43 }
 0x142   :  { %453 = vtanh.f32 %v231_v45 }
 0x148   :  { %v454_v46 = vpop.eup %453 }
 0x149   :  { %251 = vmatmul.f32.vlgmr.msra.gmra.mxu3 %v454_v46 }
 0x1cc   :  { %v252_v50 = vpop.f32.mrf.mxu3 }
 0x1cd   :  { %v255_v51 = vadd.f32 %v252_v50, %v144_v49 }
 0x1cf   :  { %455 = vtanh.f32 %v255_v51 }
 0x1d5   :  { %v456_v52 = vpop.eup %455 }
 0x1d6   :  { %275 = vmatmul.f32.vlgmr.msrb.gmra.mxu1 %v456_v52 }
 0x253   :  { %v276_v56 = vpop.f32.mrf.mxu1 }
 0x254   :  { %v279_v57 = vadd.f32 %v276_v56, %v147_v55 }
 0x256   :  { %457 = vtanh.f32 %v279_v57 }
 0x25c   :  { %v458_v58 = vpop.eup %457 }
 0x25d   :  { %299 = vmatmul.f32.vlgmr.msrb.gmra.mxu2 %v458_v58 }
 0x2e0   :  { %v300_v63 = vpop.f32.mrf.mxu2 }
 0x2e1   :  { %v303_v0 = vadd.f32 %v300_v63, %v150_v62 }
 0x2e3   :  { %459 = vtanh.f32 %v303_v0 }
 0x2e9   :  { %v460_v1 = vpop.eup %459 }
 0x2ea   :  { %323 = vmatmul.f32.vlgmr.msrb.gmra.mxu3 %v460_v1 }
 0x36d   :  { %v324_v5 = vpop.f32.mrf.mxu3 }
 0x36e   :  { %v327_v6 = vadd.f32 %v324_v5, %v153_v4 }
 0x370   :  { %461 = vtanh.f32 %v327_v6 }
 0x376   :  { %v462_v7 = vpop.eup %461 }
 0x377   :  { %347 = vmatmul.f32.vlgmr.msrb.gmra.mxu0 %v462_v7 }
 0x3f4   :  { %v348_v22 = vpop.f32.mrf.mxu0 }
 0x3f5   :  { %v351_v23 = vadd.f32 %v348_v22, %v156_v21 }
 0x3f7   :  { %463 = vtanh.f32 %v351_v23 }
 0x3fd   :  { %v464_v24 = vpop.eup %463 }
 0x3fe   :  { %371 = vmatmul.f32.vlgmr.msra.gmra.mxu1 %v464_v24 }
 0x47b   :  { %v372_v31 = vpop.f32.mrf.mxu1 }
 0x47c   :  { %v375_v32 = vadd.f32 %v372_v31, %v159_v30 }
 0x47e   :  { %465 = vtanh.f32 %v375_v32 }
 0x484   :  { %v466_v33 = vpop.eup %465 }
 0x485   :  { %417 = vmatmul.f32.vlgmr.msra.gmra.mxu2 %v466_v33 }
 0x508   :  { %v418_v36 = vpop.f32.mrf.mxu2 }
 0x509   :  { %v419_v37 = vadd.f32 %v450_v34, %v418_v36 }
 0x50b   :  { %421 = vst [vmem:[#allocation12] sm:$0xff] %v419_v37 }
 0x50c   :  { %432 = dma.vmem_to_hbm [thread:$0]  %s428_s19, 128, %s430_s22, [#allocation6]  }
 0x50d   :  { %593 = dma.done.wait [#allocation6], 128  }
 0x50e   :  { %594 = vsyncadd [#allocation6], 4294967168 }
 0x50f   :  { %437 = vsyncpa [#allocation5], 1 }
 0x510   :  { %438 = vsyncpa [#allocation8], 1 }
 0x511   :  { %439 = vsyncpa [#allocation11], 1 }
 0x512   :  { %440 = vsyncpa [#allocation6], 1 }

</bundles_post_ra>
